<compile_context>
chip_gen: v7x
topology: tpu7x:2x2x1
jax: 0.10.0
libtpu: 0.0.40
codegen_flags: <defaults>
</compile_context>

<pallas_src>
import numpy as np
import jax
import jax.numpy as jnp
from jax.experimental import pallas as pl
from jax.experimental.pallas import tpu as pltpu

LANE = 128        # TPU lane width (hidden-dim padding target)
SUBLANE = 8       # TPU sublane width (batch-tile granularity)
TILE_B_MAX = 2048 # raised per perf review; ~3-4 MiB VMEM worst case incl. double buffers


def _round_up(x, m):
    return ((x + m - 1) // m) * m


def _pad_to(x, shape):
    pads = [(0, s - d) for d, s in zip(x.shape, shape)]
    if all(p == (0, 0) for p in pads):
        return x
    return jnp.pad(x, pads)


def _choose_tiling(B, tile_b_max=TILE_B_MAX):
    """Pick (tile_b, B_pad).

    Goals (perf review): minimal batch padding (8-row sublane only), large
    tiles to amortize per-step overhead, and -- when it costs nothing -- an
    even number of >=2 grid steps so the "parallel" batch axis splits evenly
    across v7x's two TensorCores.
    """
    B_min = _round_up(max(B, 1), SUBLANE)
    n_sub = B_min // SUBLANE
    max_sub = max(tile_b_max // SUBLANE, 1)

    if n_sub <= max_sub:
        # Whole batch fits in one max tile; split exactly in two when possible
        # (even, zero-waste split for v7x megacore; e.g. B=1200 -> 2 x 600).
        if n_sub >= 2 and n_sub % 2 == 0:
            return (n_sub // 2) * SUBLANE, B_min
        return n_sub * SUBLANE, B_min

    # Batch larger than one max tile: largest sublane-multiple tile dividing
    # B_min exactly (zero pad waste).
    t_div = next(t for t in range(max_sub, 0, -1) if n_sub % t == 0)
    if 2 * t_div >= max_sub:
        # Prefer an even step count if a not-much-smaller divisor gives one.
        if (n_sub // t_div) % 2:
            for t in range(t_div - 1, t_div // 2, -1):
                if n_sub % t == 0 and (n_sub // t) % 2 == 0:
                    t_div = t
                    break
        return t_div * SUBLANE, B_min
    # No reasonable divisor: pad up to a multiple of the max tile (bounded waste).
    tile_b = max_sub * SUBLANE
    return tile_b, _round_up(B_min, tile_b)


def actor_ppo_kernel(x_ref,
                     w1_ref, b1_ref,
                     w2_ref, b2_ref,
                     w3_ref, b3_ref,
                     w4_ref, b4_ref,
                     out_ref):
    """Fused 4-layer MLP: Linear+ReLU, Linear+ReLU, Linear+Hardswish, Linear, tanh.

    x is f32 in VMEM (cast to bf16 here, on the VPU); weights are bf16 (MXU
    full rate); accumulation and all elementwise math are f32 (v5e-safe).
    """
    x = x_ref[...].astype(jnp.bfloat16)                 # (tile_b, state_dim)

    # layer 1: Linear + ReLU
    h = jnp.dot(x, w1_ref[...], preferred_element_type=jnp.float32)
    h = jnp.maximum(h + b1_ref[...], 0.0)

    # layer 2: Linear + ReLU
    h = jnp.dot(h.astype(jnp.bfloat16), w2_ref[...],
                preferred_element_type=jnp.float32)
    h = jnp.maximum(h + b2_ref[...], 0.0)

    # layer 3: Linear + Hardswish: x * clamp(x+3, 0, 6) / 6
    h = jnp.dot(h.astype(jnp.bfloat16), w3_ref[...],
                preferred_element_type=jnp.float32)
    h = h + b3_ref[...]
    h = h * jnp.clip(h + 3.0, 0.0, 6.0) * (1.0 / 6.0)

    # layer 4: Linear (unpadded action_dim output), then tanh
    h = jnp.dot(h.astype(jnp.bfloat16), w4_ref[...],
                preferred_element_type=jnp.float32)
    out_ref[...] = jnp.tanh(h + b4_ref[...])


def actor_ppo_forward(state, params, tile_b_max=TILE_B_MAX):
    """state: [B, state_dim] float32; params: dict of (in,out) weights, (1,out) biases."""
    B, state_dim = state.shape
    mid_dim = params["w1"].shape[1]
    action_dim = params["w4"].shape[1]

    # Only the hidden dim is lane-padded (intermediates stay in VMEM).  The
    # state / action dims keep their natural width; their blocks use the full
    # array extent, which satisfies the (8,128) block rule.
    MP = _round_up(max(mid_dim, 1), LANE)

    tile_b, B_pad = _choose_tiling(B, tile_b_max)
    grid = (B_pad // tile_b,)

    # Input stays f32 and un-lane-padded in HBM (bf16 cast happens in-kernel).
    # Batch is padded only to the tiling granularity (zero rows, sliced off).
    x = _pad_to(state, (B_pad, state_dim)).astype(jnp.float32)

    # Weights/biases are tiny and VMEM-resident; bf16 weights, f32 biases.
    w1 = _pad_to(params["w1"], (state_dim, MP)).astype(jnp.bfloat16)
    w2 = _pad_to(params["w2"], (MP, MP)).astype(jnp.bfloat16)
    w3 = _pad_to(params["w3"], (MP, MP)).astype(jnp.bfloat16)
    w4 = _pad_to(params["w4"], (MP, action_dim)).astype(jnp.bfloat16)
    b1 = _pad_to(params["b1"], (1, MP)).astype(jnp.float32)
    b2 = _pad_to(params["b2"], (1, MP)).astype(jnp.float32)
    b3 = _pad_to(params["b3"], (1, MP)).astype(jnp.float32)
    b4 = params["b4"].astype(jnp.float32)                   # (1, action_dim)

    const = lambda i: (0, 0)   # same block every grid step -> VMEM-resident

    out = pl.pallas_call(
        actor_ppo_kernel,
        out_shape=jax.ShapeDtypeStruct((B_pad, action_dim), jnp.float32),
        grid=grid,
        in_specs=[
            pl.BlockSpec((tile_b, state_dim), lambda i: (i, 0)),  # x: batch-tiled, f32
            pl.BlockSpec((state_dim, MP), const), pl.BlockSpec((1, MP), const),
            pl.BlockSpec((MP, MP), const),        pl.BlockSpec((1, MP), const),
            pl.BlockSpec((MP, MP), const),        pl.BlockSpec((1, MP), const),
            pl.BlockSpec((MP, action_dim), const), pl.BlockSpec((1, action_dim), const),
        ],
        out_specs=pl.BlockSpec((tile_b, action_dim), lambda i: (i, 0)),
        compiler_params=pltpu.CompilerParams(
            dimension_semantics=("parallel",),      # shard batch tiles across TCs (v7x)
            vmem_limit_bytes=32 * 1024 * 1024,      # plenty for this footprint on v5e/v6e/v7x
        ),
    )(x, w1, b1, w2, b2, w3, b3, w4, b4)

    return out[:B] if B_pad != B else out


def init_params(key, state_dim, mid_dim, action_dim):
    """Deterministic synthetic init mirroring the PyTorch shapes.

    PyTorch Linear weight is (out, in); we store transposed (in, out).
    Last layer mimics layer_norm(layer, std=0.1, bias_const=1e-6).
    """
    k1, k2, k3, k4 = jax.random.split(key, 4)

    def lin(k, fan_in, fan_out, scale):
        return jax.random.normal(k, (fan_in, fan_out), jnp.float32) * scale

    return {
        "w1": lin(k1, state_dim, mid_dim, 1.0 / np.sqrt(state_dim)),
        "b1": jnp.zeros((1, mid_dim), jnp.float32),
        "w2": lin(k2, mid_dim, mid_dim, 1.0 / np.sqrt(mid_dim)),
        "b2": jnp.zeros((1, mid_dim), jnp.float32),
        "w3": lin(k3, mid_dim, mid_dim, 1.0 / np.sqrt(mid_dim)),
        "b3": jnp.zeros((1, mid_dim), jnp.float32),
        "w4": lin(k4, mid_dim, action_dim, 0.1 / np.sqrt(mid_dim)),
        "b4": jnp.full((1, action_dim), 1e-6, jnp.float32),
    }


def reference_forward(state, params):
    """Pure-JAX f32 reference for correctness check."""
    def hardswish(x):
        return x * jnp.clip(x + 3.0, 0.0, 6.0) / 6.0
    h = jnp.maximum(state @ params["w1"] + params["b1"], 0.0)
    h = jnp.maximum(h @ params["w2"] + params["b2"], 0.0)
    h = hardswish(h @ params["w3"] + params["b3"])
    h = h @ params["w4"] + params["b4"]
    return jnp.tanh(h)


if __name__ == "__main__":
    # small shapes consistent with the module: batch=2, state_dim=32,
    # mid_dim=32, action_dim=8
    B, STATE_DIM, MID_DIM, ACTION_DIM = 2, 32, 32, 8

    key = jax.random.PRNGKey(0)
    k_state, k_params, k_big = jax.random.split(key, 3)

    params = init_params(k_params, STATE_DIM, MID_DIM, ACTION_DIM)

    # tiny deployment-style batch (padded only to one 8-row sublane tile)
    state = jax.random.normal(k_state, (B, STATE_DIM), jnp.float32)
    out = jax.block_until_ready(actor_ppo_forward(state, params))
    ref = reference_forward(state, params)
    assert out.shape == (B, ACTION_DIM)
    # bf16 matmul operands (f32 accumulate) -> relaxed tolerance vs f32 reference
    np.testing.assert_allclose(np.asarray(out), np.asarray(ref), rtol=1e-2, atol=1e-2)

    # larger training-style batch: exercises zero-pad tiling (tile_b=600,
    # grid=2 -> even split across v7x's two TensorCores) and pipelining
    big_state = jax.random.normal(k_big, (1200, STATE_DIM), jnp.float32)
    big_out = jax.block_until_ready(actor_ppo_forward(big_state, params))
    big_ref = reference_forward(big_state, params)
    assert big_out.shape == (1200, ACTION_DIM)
    np.testing.assert_allclose(np.asarray(big_out), np.asarray(big_ref),
                               rtol=1e-2, atol=1e-2)

    # TODO(synk): ConvNet branch (image-state tuple state_dim) not implemented —
    # module is exercised with the int state_dim (MLP) branch only.
    print("KERNEL_OK")
</pallas_src>

<mosaic_0001>
module attributes {stable_mosaic.version = 11 : i64} {
  func.func @actor_ppo_kernel(%arg0: i32, %arg1: memref<8x32xf32, #tpu.memory_space<vmem>>, %arg2: memref<32x128xbf16, #tpu.memory_space<vmem>>, %arg3: memref<1x128xf32, #tpu.memory_space<vmem>>, %arg4: memref<128x128xbf16, #tpu.memory_space<vmem>>, %arg5: memref<1x128xf32, #tpu.memory_space<vmem>>, %arg6: memref<128x128xbf16, #tpu.memory_space<vmem>>, %arg7: memref<1x128xf32, #tpu.memory_space<vmem>>, %arg8: memref<128x8xbf16, #tpu.memory_space<vmem>>, %arg9: memref<1x8xf32, #tpu.memory_space<vmem>>, %arg10: memref<8x8xf32, #tpu.memory_space<vmem>>) attributes {dimension_semantics = [#tpu.dimension_semantics<parallel>], iteration_bounds = array<i64: 1>, scalar_prefetch = 0 : i64, scratch_operands = 0 : i64, tpu.core_type = #tpu.core_type<tc>, window_params = [{transform_indices = @transform_0, window_bounds = array<i64: 8, 32>}, {pipeline_mode = #tpu.pipeline_mode<synchronous>, transform_indices = @transform_1, window_bounds = array<i64: 32, 128>}, {pipeline_mode = #tpu.pipeline_mode<synchronous>, transform_indices = @transform_2, window_bounds = array<i64: 1, 128>}, {pipeline_mode = #tpu.pipeline_mode<synchronous>, transform_indices = @transform_3, window_bounds = array<i64: 128, 128>}, {pipeline_mode = #tpu.pipeline_mode<synchronous>, transform_indices = @transform_4, window_bounds = array<i64: 1, 128>}, {pipeline_mode = #tpu.pipeline_mode<synchronous>, transform_indices = @transform_5, window_bounds = array<i64: 128, 128>}, {pipeline_mode = #tpu.pipeline_mode<synchronous>, transform_indices = @transform_6, window_bounds = array<i64: 1, 128>}, {pipeline_mode = #tpu.pipeline_mode<synchronous>, transform_indices = @transform_7, window_bounds = array<i64: 128, 8>}, {pipeline_mode = #tpu.pipeline_mode<synchronous>, transform_indices = @transform_8, window_bounds = array<i64: 1, 8>}, {transform_indices = @transform_9, window_bounds = array<i64: 8, 8>}]} {
    %c0 = arith.constant 0 : index
    %c0_0 = arith.constant 0 : index
    %0 = vector.load %arg1[%c0, %c0_0] : memref<8x32xf32, #tpu.memory_space<vmem>>, vector<8x32xf32>
    %1 = arith.truncf %0 : vector<8x32xf32> to vector<8x32xbf16>
    %c0_1 = arith.constant 0 : index
    %c0_2 = arith.constant 0 : index
    %2 = vector.load %arg2[%c0_1, %c0_2] : memref<32x128xbf16, #tpu.memory_space<vmem>>, vector<32x128xbf16>
    %cst = arith.constant dense<0.000000e+00> : vector<8x128xf32>
    %3 = tpu.matmul %1, %2, %cst {dimension_numbers = #tpu.dot_dimension_numbers<[1], [0], [0], [1], [0, 0, 1, 1], [], []>} : vector<8x32xbf16>, vector<32x128xbf16>, vector<8x128xf32> -> vector<8x128xf32>
    %c0_3 = arith.constant 0 : index
    %c0_4 = arith.constant 0 : index
    %4 = vector.load %arg3[%c0_3, %c0_4] : memref<1x128xf32, #tpu.memory_space<vmem>>, vector<1x128xf32>
    %5 = vector.broadcast %4 : vector<1x128xf32> to vector<8x128xf32>
    %6 = arith.addf %3, %5 : vector<8x128xf32>
    %cst_5 = arith.constant 0.000000e+00 : f32
    %7 = vector.broadcast %cst_5 : f32 to vector<8x128xf32>
    %8 = arith.maximumf %6, %7 : vector<8x128xf32>
    %9 = arith.truncf %8 : vector<8x128xf32> to vector<8x128xbf16>
    %c0_6 = arith.constant 0 : index
    %c0_7 = arith.constant 0 : index
    %10 = vector.load %arg4[%c0_6, %c0_7] : memref<128x128xbf16, #tpu.memory_space<vmem>>, vector<128x128xbf16>
    %cst_8 = arith.constant dense<0.000000e+00> : vector<8x128xf32>
    %11 = tpu.matmul %9, %10, %cst_8 {dimension_numbers = #tpu.dot_dimension_numbers<[1], [0], [0], [1], [0, 0, 1, 1], [], []>} : vector<8x128xbf16>, vector<128x128xbf16>, vector<8x128xf32> -> vector<8x128xf32>
    %c0_9 = arith.constant 0 : index
    %c0_10 = arith.constant 0 : index
    %12 = vector.load %arg5[%c0_9, %c0_10] : memref<1x128xf32, #tpu.memory_space<vmem>>, vector<1x128xf32>
    %13 = vector.broadcast %12 : vector<1x128xf32> to vector<8x128xf32>
    %14 = arith.addf %11, %13 : vector<8x128xf32>
    %cst_11 = arith.constant 0.000000e+00 : f32
    %15 = vector.broadcast %cst_11 : f32 to vector<8x128xf32>
    %16 = arith.maximumf %14, %15 : vector<8x128xf32>
    %17 = arith.truncf %16 : vector<8x128xf32> to vector<8x128xbf16>
    %c0_12 = arith.constant 0 : index
    %c0_13 = arith.constant 0 : index
    %18 = vector.load %arg6[%c0_12, %c0_13] : memref<128x128xbf16, #tpu.memory_space<vmem>>, vector<128x128xbf16>
    %cst_14 = arith.constant dense<0.000000e+00> : vector<8x128xf32>
    %19 = tpu.matmul %17, %18, %cst_14 {dimension_numbers = #tpu.dot_dimension_numbers<[1], [0], [0], [1], [0, 0, 1, 1], [], []>} : vector<8x128xbf16>, vector<128x128xbf16>, vector<8x128xf32> -> vector<8x128xf32>
    %c0_15 = arith.constant 0 : index
    %c0_16 = arith.constant 0 : index
    %20 = vector.load %arg7[%c0_15, %c0_16] : memref<1x128xf32, #tpu.memory_space<vmem>>, vector<1x128xf32>
    %21 = vector.broadcast %20 : vector<1x128xf32> to vector<8x128xf32>
    %22 = arith.addf %19, %21 : vector<8x128xf32>
    %cst_17 = arith.constant 3.000000e+00 : f32
    %23 = vector.broadcast %cst_17 : f32 to vector<8x128xf32>
    %24 = arith.addf %22, %23 : vector<8x128xf32>
    %cst_18 = arith.constant 0.000000e+00 : f32
    %cst_19 = arith.constant 6.000000e+00 : f32
    %25 = vector.broadcast %cst_18 : f32 to vector<8x128xf32>
    %26 = arith.maximumf %25, %24 : vector<8x128xf32>
    %27 = vector.broadcast %cst_19 : f32 to vector<8x128xf32>
    %28 = arith.minimumf %27, %26 : vector<8x128xf32>
    %29 = arith.mulf %22, %28 : vector<8x128xf32>
    %cst_20 = arith.constant 0.166666672 : f32
    %30 = vector.broadcast %cst_20 : f32 to vector<8x128xf32>
    %31 = arith.mulf %29, %30 : vector<8x128xf32>
    %32 = arith.truncf %31 : vector<8x128xf32> to vector<8x128xbf16>
    %c0_21 = arith.constant 0 : index
    %c0_22 = arith.constant 0 : index
    %33 = vector.load %arg8[%c0_21, %c0_22] : memref<128x8xbf16, #tpu.memory_space<vmem>>, vector<128x8xbf16>
    %cst_23 = arith.constant dense<0.000000e+00> : vector<8x8xf32>
    %34 = tpu.matmul %32, %33, %cst_23 {dimension_numbers = #tpu.dot_dimension_numbers<[1], [0], [0], [1], [0, 0, 1, 1], [], []>} : vector<8x128xbf16>, vector<128x8xbf16>, vector<8x8xf32> -> vector<8x8xf32>
    %c0_24 = arith.constant 0 : index
    %c0_25 = arith.constant 0 : index
    %35 = vector.load %arg9[%c0_24, %c0_25] : memref<1x8xf32, #tpu.memory_space<vmem>>, vector<1x8xf32>
    %36 = vector.broadcast %35 : vector<1x8xf32> to vector<8x8xf32>
    %37 = arith.addf %34, %36 : vector<8x8xf32>
    %38 = math.tanh %37 : vector<8x8xf32>
    %c0_26 = arith.constant 0 : index
    %c0_27 = arith.constant 0 : index
    %39 = vector.load %arg10[%c0_26, %c0_27] : memref<8x8xf32, #tpu.memory_space<vmem>>, vector<8x8xf32>
    tpu.vector_store %arg10[%c0_26, %c0_27], %38 {strides = array<i32>} : memref<8x8xf32, #tpu.memory_space<vmem>>, vector<8x8xf32>,
    return
  }
  func.func @transform_0(%arg0: i32) -> (i32, i32) {
    %c0_i32 = arith.constant 0 : i32
    %c0_i32_0 = arith.constant 0 : i32
    return %arg0, %c0_i32 : i32, i32
  }
  func.func @transform_1(%arg0: i32) -> (i32, i32) {
    %c0_i32 = arith.constant 0 : i32
    %c0_i32_0 = arith.constant 0 : i32
    %c0_i32_1 = arith.constant 0 : i32
    return %c0_i32, %c0_i32_0 : i32, i32
  }
  func.func @transform_2(%arg0: i32) -> (i32, i32) {
    %c0_i32 = arith.constant 0 : i32
    %c0_i32_0 = arith.constant 0 : i32
    %c0_i32_1 = arith.constant 0 : i32
    return %c0_i32, %c0_i32_0 : i32, i32
  }
  func.func @transform_3(%arg0: i32) -> (i32, i32) {
    %c0_i32 = arith.constant 0 : i32
    %c0_i32_0 = arith.constant 0 : i32
    %c0_i32_1 = arith.constant 0 : i32
    return %c0_i32, %c0_i32_0 : i32, i32
  }
  func.func @transform_4(%arg0: i32) -> (i32, i32) {
    %c0_i32 = arith.constant 0 : i32
    %c0_i32_0 = arith.constant 0 : i32
    %c0_i32_1 = arith.constant 0 : i32
    return %c0_i32, %c0_i32_0 : i32, i32
  }
  func.func @transform_5(%arg0: i32) -> (i32, i32) {
    %c0_i32 = arith.constant 0 : i32
    %c0_i32_0 = arith.constant 0 : i32
    %c0_i32_1 = arith.constant 0 : i32
    return %c0_i32, %c0_i32_0 : i32, i32
  }
  func.func @transform_6(%arg0: i32) -> (i32, i32) {
    %c0_i32 = arith.constant 0 : i32
    %c0_i32_0 = arith.constant 0 : i32
    %c0_i32_1 = arith.constant 0 : i32
    return %c0_i32, %c0_i32_0 : i32, i32
  }
  func.func @transform_7(%arg0: i32) -> (i32, i32) {
    %c0_i32 = arith.constant 0 : i32
    %c0_i32_0 = arith.constant 0 : i32
    %c0_i32_1 = arith.constant 0 : i32
    return %c0_i32, %c0_i32_0 : i32, i32
  }
  func.func @transform_8(%arg0: i32) -> (i32, i32) {
    %c0_i32 = arith.constant 0 : i32
    %c0_i32_0 = arith.constant 0 : i32
    %c0_i32_1 = arith.constant 0 : i32
    return %c0_i32, %c0_i32_0 : i32, i32
  }
  func.func @transform_9(%arg0: i32) -> (i32, i32) {
    %c0_i32 = arith.constant 0 : i32
    %c0_i32_0 = arith.constant 0 : i32
    return %arg0, %c0_i32 : i32, i32
  }
}

</mosaic_0001>

<bundles_post_ra>
// kernel: tpu_custom_call.1
= control target key start
LH: loop header
LB: loop body
LE: loop exit
PB: predicated region body
PF: predicated region fallthrough
CT: control target
= control target key end

     0   :  { %14 = vsyncpa [#allocation3], 0  ;;  %s919_s0 = inlined_call_operand.vmem [shape: f32[8,32], index: 0, kind: input, shape index: {}]   ;;  %s920_s1 = inlined_call_operand.hbm [shape: bf16[32,128], index: 1, kind: input, shape index: {}]   ;;  %s921_s2 = inlined_call_operand.vmem [shape: f32[1,128], index: 2, kind: input, shape index: {}]   ;;  %s922_s3 = inlined_call_operand.vmem [shape: bf16[128,128], index: 3, kind: input, shape index: {}]   ;;  %s923_s4 = inlined_call_operand.vmem [shape: f32[1,128], index: 4, kind: input, shape index: {}]   ;;  %s924_s5 = inlined_call_operand.hbm [shape: bf16[128,128], index: 5, kind: input, shape index: {}]   ;;  %s925_s6 = inlined_call_operand.vmem [shape: f32[1,128], index: 6, kind: input, shape index: {}]   ;;  %s926_s7 = inlined_call_operand.vmem [shape: bf16[128,8], index: 7, kind: input, shape index: {}]   ;;  %s927_s8 = inlined_call_operand.vmem [shape: f32[1,8], index: 8, kind: input, shape index: {}]   ;;  %s928_s9 = inlined_call_operand.hbm [shape: f32[8,8], index: 9, kind: output, shape index: {}]  }
   0x1   :  { %15 = vsyncpa [#allocation6], 0 }
   0x2   :  { %16 = vsyncpa [#allocation4], 0  ;;  %s729_s30 = smov [#allocation2]   ;;  %s657_s13 = scalar_lea.hbm %s920_s1, 256 }
   0x3   :  { %s24_s10 = sshll.u32 %s729_s30, 4  ;;  %p658_p0 = scmp.ne.s32.totalorder %s920_s1, %s657_s13  ;;  %s25_s10 = int_to_ptr.vmem [resolvable:$true] %s24_s10 }
   0x4   :  { %p661_p1 = scmp.lt.u32.totalorder %s657_s13, %s920_s1 }
   0x6   :  { %p663_p2 = pnand %p661_p1, %p658_p0 }
   0x8   :  { %666 = shalt.err (!%p663_p2)
}
   0x9   :  { %s667_s18 = scalar_lea.vmem %s25_s10, 256  ;;  %p672_p4 = scmp.lt.s32.totalorder %s25_s10, %s25_s10 }
   0xa   :  { %p668_p3 = scmp.ne.s32.totalorder %s25_s10, %s667_s18  ;;  %p673_p5 = scmp.lt.s32.totalorder %s667_s18, %s667_s18 }
   0xc   :  { %p674_p6 = por %p673_p5, %p672_p4 }
   0xe   :  { %p675_p7 = pnand %p674_p6, %p668_p3 }
  0x10   :  { %678 = shalt.err (!%p675_p7)
}
  0x11   :  { %s730_s19 = smov 64   ;;  %s731_s20 = smov 4  }
  0x12   :  { %30 = dma.hbm_to_vmem [thread:$0]  %s920_s1, 256, %s25_s10, [#allocation3], %s730_s19, %s730_s19, %s731_s20  }
  0x13   :  { %s732_s23 = smov [#allocation5]   ;;  %s679_s27 = scalar_lea.hbm %s924_s5, 1024 }
  0x14   :  { %s42_s24 = sshll.u32 %s732_s23, 4  ;;  %p680_p8 = scmp.ne.s32.totalorder %s924_s5, %s679_s27  ;;  %s43_s24 = int_to_ptr.vmem [resolvable:$true] %s42_s24 }
  0x15   :  { %p683_p9 = scmp.lt.u32.totalorder %s679_s27, %s924_s5 }
  0x17   :  { %p685_p10 = pnand %p683_p9, %p680_p8 }
  0x19   :  { %688 = shalt.err (!%p685_p10)
}
  0x1a   :  { %s689_s12 = scalar_lea.vmem %s43_s24, 1024  ;;  %p694_p12 = scmp.lt.s32.totalorder %s43_s24, %s43_s24 }
  0x1b   :  { %p690_p11 = scmp.ne.s32.totalorder %s43_s24, %s689_s12  ;;  %p695_p13 = scmp.lt.s32.totalorder %s689_s12, %s689_s12 }
  0x1d   :  { %p696_p0 = por %p695_p13, %p694_p12 }
  0x1f   :  { %p697_p1 = pnand %p696_p0, %p690_p11 }
  0x21   :  { %700 = shalt.err (!%p697_p1)
}
  0x22   :  { %48 = dma.hbm_to_vmem [thread:$0]  %s924_s5, 1024, %s43_s24, [#allocation6], %s730_s19, %s730_s19, %s731_s20  }
  0x23   :  { %723 = dma.done.wait [#allocation3], 256  }
  0x24   :  { %724 = vsyncadd [#allocation3], 4294967040 }
  0x25   :  { %725 = dma.done.wait [#allocation6], 1024  }
  0x26   :  { %726 = vsyncadd [#allocation6], 4294966272  ;;  %v733_v0 = vmov 0.0   ;;  %vm734_vm0 = vmmov 0   ;;  %v629_v1 = vld [vmem:[#allocation2] sm:$0xff]   ;;  %v630_v2 = vld [vmem:[#allocation2 + $0x8] sm:$0xff]  }
  0x27   :  { %554 = vmatprep.subr.bf16.mxu0 %v733_v0  ;;  %558 = vmatprep.mubr.msk.bf16.mxu0 %vm734_vm0, %v733_v0  ;;  %v62_v3 = vld [vmem:[%s919_s0] sm:$0xff]  ;;  %v632_v6 = vld [vmem:[%s922_s3 + $0x8] sm:$0xff]   ;;  %vm87_vm1 = vcmask 261120   ;;  %v633_v7 = vld [vmem:[%s922_s3 + $0x10] sm:$0xff]   ;;  %vm475_vm2 = vcmask 64512  }
  0x28   :  { %562 = vmatprep.subr.bf16.mxu1 %v733_v0  ;;  %578 = vmatprep.mubr.msk.bf16.mxu1 %vm734_vm0, %v733_v0  ;;  %v631_v4 = vld [vmem:[%s922_s3] sm:$0xff]   ;;  %v63_v5 = vpack.c.bf16 %v62_v3, %v62_v3  ;;  %v634_v8 = vld [vmem:[%s922_s3 + $0x18] sm:$0xff]   ;;  %v636_v10 = vld [vmem:[%s922_s3 + $0x28] sm:$0xff]  }
  0x29   :  { %555 = vmatpush3.bf16.msra.mxu0 %v629_v1  ;;  %563 = vmatpush3.bf16.msra.mxu1 %v631_v4  ;;  %v635_v9 = vld [vmem:[%s922_s3 + $0x20] sm:$0xff]   ;;  %v637_v11 = vld [vmem:[%s922_s3 + $0x30] sm:$0xff]   ;;  %v638_v12 = vld [vmem:[%s922_s3 + $0x38] sm:$0xff]  }
  0x2a   :  { %556 = vmatprep.subr.bf16.mxu0 %v733_v0  ;;  %564 = vmatprep.subr.bf16.mxu1 %v733_v0  ;;  %v639_v13 = vld [vmem:[#allocation5] sm:$0xff]   ;;  %v640_v14 = vld [vmem:[#allocation5 + $0x8] sm:$0xff]   ;;  %v641_v15 = vld [vmem:[#allocation5 + $0x10] sm:$0xff]  }
  0x2b   :  { %v642_v16 = vld [vmem:[#allocation5 + $0x18] sm:$0xff]   ;;  %v643_v17 = vld [vmem:[#allocation5 + $0x20] sm:$0xff]   ;;  %v644_v18 = vld [vmem:[#allocation5 + $0x28] sm:$0xff]  }
  0x2c   :  { %v493_v19 = vld [vmem:[%s921_s2] ss:$0 sm:$0xff]  ;;  %v646_v28 = vld [vmem:[#allocation5 + $0x38] sm:$0xff]   ;;  %v649_v31 = vld [vmem:[%s926_s7 + $0x10] sm:$0xff]  }
  0x2d   :  { %557 = vmatpush3.bf16.msra.mxu0 %v630_v2  ;;  %565 = vmatpush3.bf16.msra.mxu1 %v632_v6  ;;  %v645_v27 = vld [vmem:[#allocation5 + $0x30] sm:$0xff]   ;;  %v648_v30 = vld [vmem:[%s926_s7 + $0x8] sm:$0xff]   ;;  %v650_v32 = vld [vmem:[%s926_s7 + $0x18] sm:$0xff]  }
  0x2e   :  { %582 = vmatprep.subr.bf16.mxu0 %v733_v0  ;;  %566 = vmatprep.subr.bf16.mxu1 %v733_v0  ;;  %v647_v29 = vld [vmem:[%s926_s7] sm:$0xff]   ;;  %v652_v42 = vld [vmem:[%s926_s7 + $0x28] sm:$0xff]   ;;  %v653_v43 = vld [vmem:[%s926_s7 + $0x30] sm:$0xff]  }
  0x2f   :  { %v497_v33 = vld [vmem:[%s923_s4] ss:$0 sm:$0xff]  ;;  %v654_v44 = vld [vmem:[%s926_s7 + $0x38] sm:$0xff]  }
  0x30   :  { %559 = vmatmul.mubr.msk.bf16.vlgmr.msra.gmra.mrb[0].mxu0 %vm87_vm1, %v63_v5  ;;  %v651_v41 = vld [vmem:[%s926_s7 + $0x20] sm:$0xff]  }
  0x31   :  { %598 = vmatprep.mubr.msk.bf16.mxu0 %vm734_vm0, %v733_v0  ;;  %567 = vmatpush3.bf16.msra.mxu1 %v633_v7  ;;  %v506_v45 = vld [vmem:[%s925_s6] ss:$0 sm:$0xff]  ;;  %s735_s6 = smov [#allocation7]  }
  0x32   :  { %568 = vmatprep.subr.bf16.mxu1 %v733_v0  ;;  %583 = vmatpush3.bf16.msra.mxu0 %v639_v13  ;;  %v515_v57 = vld [vmem:[%s927_s8] ss:$0 sm:$0xff]  ;;  %s483_s7 = sshll.u32 %s735_s6, 4  ;;  %s484_s7 = int_to_ptr.vmem [resolvable:$true] %s483_s7 }
  0x33   :  { %584 = vmatprep.subr.bf16.mxu0 %v733_v0  ;;  %s701_s26 = scalar_lea.vmem %s484_s7, 128  ;;  %p706_p3 = scmp.lt.s32.totalorder %s484_s7, %s484_s7 }
  0x34   :  { %p702_p2 = scmp.ne.s32.totalorder %s484_s7, %s701_s26  ;;  %p707_p4 = scmp.lt.s32.totalorder %s701_s26, %s701_s26 }
  0x35   :  { %569 = vmatpush3.bf16.msra.mxu1 %v634_v8 }
  0x36   :  { %570 = vmatprep.subr.bf16.mxu1 %v733_v0  ;;  %585 = vmatpush3.bf16.msra.mxu0 %v640_v14  ;;  %p708_p5 = por %p707_p4, %p706_p3 }
  0x37   :  { %586 = vmatprep.subr.bf16.mxu0 %v733_v0 }
  0x38   :  { %p709_p6 = pnand %p708_p5, %p702_p2 }
  0x39   :  { %571 = vmatpush3.bf16.msra.mxu1 %v635_v9 }
  0x3a   :  { %572 = vmatprep.subr.bf16.mxu1 %v733_v0  ;;  %587 = vmatpush3.bf16.msra.mxu0 %v641_v15 }
  0x3b   :  { %588 = vmatprep.subr.bf16.mxu0 %v733_v0 }
  0x3d   :  { %573 = vmatpush3.bf16.msra.mxu1 %v636_v10 }
  0x3e   :  { %574 = vmatprep.subr.bf16.mxu1 %v733_v0  ;;  %589 = vmatpush3.bf16.msra.mxu0 %v642_v16 }
  0x3f   :  { %590 = vmatprep.subr.bf16.mxu0 %v733_v0 }
  0x41   :  { %575 = vmatpush3.bf16.msra.mxu1 %v637_v11 }
  0x42   :  { %576 = vmatprep.subr.bf16.mxu1 %v733_v0  ;;  %591 = vmatpush3.bf16.msra.mxu0 %v643_v17 }
  0x43   :  { %592 = vmatprep.subr.bf16.mxu0 %v733_v0 }
  0x45   :  { %577 = vmatpush3.bf16.msra.mxu1 %v638_v12 }
  0x46   :  { %602 = vmatprep.subr.bf16.mxu1 %v733_v0  ;;  %593 = vmatpush3.bf16.msra.mxu0 %v644_v18 }
  0x47   :  { %594 = vmatprep.subr.bf16.mxu0 %v733_v0 }
  0x4a   :  { %595 = vmatpush3.bf16.msra.mxu0 %v645_v27 }
  0x4b   :  { %596 = vmatprep.subr.bf16.mxu0 %v733_v0 }
  0x4e   :  { %597 = vmatpush3.bf16.msra.mxu0 %v646_v28 }
 0x103   :  { %v125_v20 = vpop.f32.mrb[0].mxu0 }
 0x104   :  { %v126_v21 = vadd.f32 %v493_v19, %v125_v20  ;;  %v560_v22 = vpop.f32.mrb[1].mxu0 }
 0x105   :  { %v128_v23 = vpop.f32.mrb[2].mxu0 }
 0x106   :  { %v131_v24 = vmax.f32 %v126_v21, 0.0  ;;  %v561_v25 = vpop.f32.mrb[3].mxu0 }
 0x108   :  { %v132_v26 = vpack.c.bf16 %v131_v24, %v131_v24 }
 0x10a   :  { %579 = vmatmul.mubr.bf16.vlgmr.msra.gmra.mrb[0].mxu1 %v132_v26 }
 0x10b   :  { %618 = vmatprep.mubr.msk.bf16.mxu1 %vm734_vm0, %v733_v0  ;;  %603 = vmatpush3.bf16.msra.mxu1 %v647_v29 }
 0x10c   :  { %604 = vmatprep.subr.bf16.mxu1 %v733_v0 }
 0x10f   :  { %605 = vmatpush3.bf16.msra.mxu1 %v648_v30 }
 0x110   :  { %606 = vmatprep.subr.bf16.mxu1 %v733_v0 }
 0x113   :  { %607 = vmatpush3.bf16.msra.mxu1 %v649_v31 }
 0x114   :  { %608 = vmatprep.subr.bf16.mxu1 %v733_v0 }
 0x117   :  { %609 = vmatpush3.bf16.msra.mxu1 %v650_v32 }
 0x118   :  { %610 = vmatprep.subr.bf16.mxu1 %v733_v0 }
 0x11b   :  { %611 = vmatpush3.bf16.msra.mxu1 %v651_v41 }
 0x11c   :  { %612 = vmatprep.subr.bf16.mxu1 %v733_v0 }
 0x11f   :  { %613 = vmatpush3.bf16.msra.mxu1 %v652_v42 }
 0x120   :  { %614 = vmatprep.subr.bf16.mxu1 %v733_v0 }
 0x123   :  { %615 = vmatpush3.bf16.msra.mxu1 %v653_v43 }
 0x124   :  { %616 = vmatprep.subr.bf16.mxu1 %v733_v0 }
 0x127   :  { %617 = vmatpush3.bf16.msra.mxu1 %v654_v44 }
 0x1dd   :  { %v238_v34 = vpop.f32.mrb[0].mxu1 }
 0x1de   :  { %v239_v35 = vadd.f32 %v497_v33, %v238_v34  ;;  %v580_v36 = vpop.f32.mrb[1].mxu1 }
 0x1df   :  { %v241_v37 = vpop.f32.mrb[2].mxu1 }
 0x1e0   :  { %v244_v38 = vmax.f32 %v239_v35, 0.0  ;;  %v581_v39 = vpop.f32.mrb[3].mxu1 }
 0x1e2   :  { %v245_v40 = vpack.c.bf16 %v244_v38, %v244_v38 }
 0x1e4   :  { %599 = vmatmul.mubr.bf16.vlgmr.msra.gmra.mrb[4].mxu0 %v245_v40 }
 0x2b7   :  { %v351_v46 = vpop.f32.mrb[4].mxu0 }
 0x2b8   :  { %v352_v47 = vadd.f32 %v506_v45, %v351_v46  ;;  %v600_v48 = vpop.f32.mrb[5].mxu0 }
 0x2b9   :  { %v354_v49 = vpop.f32.mrb[6].mxu0 }
 0x2ba   :  { %v357_v50 = vadd.f32 3.0, %v352_v47  ;;  %v601_v51 = vpop.f32.mrb[7].mxu0 }
 0x2bc   :  { %v358_v52 = vmax.f32 %v357_v50, 0.0 }
 0x2be   :  { %v359_v53 = vmin.f32 %v358_v52, 6.0 }
 0x2c0   :  { %v360_v54 = vmul.f32 %v359_v53, %v352_v47 }
 0x2c2   :  { %v361_v55 = vmul.f32 0.16666667, %v360_v54 }
 0x2c4   :  { %v362_v56 = vpack.c.bf16 %v361_v55, %v361_v55 }
 0x2c6   :  { %619 = vmatmul.mubr.bf16.vlgmr.msra.gmra.mrb[4].mxu1 %v362_v56 }
 0x399   :  { %v468_v58 = vpop.f32.mrb[4].mxu1 }
 0x39a   :  { %v469_v59 = vadd.f32 %v515_v57, %v468_v58  ;;  %v620_v60 = vpop.f32.mrb[5].mxu1 }
 0x39b   :  { %v471_v61 = vpop.f32.mrb[6].mxu1 }
 0x39c   :  { %655 = vtanh.f32 %v469_v59  ;;  %v621_v62 = vpop.f32.mrb[7].mxu1 }
 0x3a6   :  { %v656_v63 = vpop.eup %655 }
 0x3a7   :  { %476 = vst.msk [vmem:[#allocation7] sm:$0xff] %vm475_vm2, %v656_v63 }
 0x3a8   :  { %712 = shalt.err (!%p709_p6)
}
 0x3a9   :  { %s713_s28 = scalar_lea.hbm %s928_s9, 128 }
 0x3aa   :  { %p714_p7 = scmp.ne.s32.totalorder %s928_s9, %s713_s28  ;;  %p717_p8 = scmp.lt.u32.totalorder %s713_s28, %s928_s9 }
 0x3ac   :  { %p719_p9 = pnand %p717_p8, %p714_p7 }
 0x3ae   :  { %722 = shalt.err (!%p719_p9)
}
 0x3af   :  { %486 = dma.vmem_to_hbm [thread:$0]  %s484_s7, 128, %s928_s9, [#allocation4]  }
 0x3b0   :  { %727 = dma.done.wait [#allocation4], 128  }
 0x3b1   :  { %728 = vsyncadd [#allocation4], 4294967168 }
 0x3b2   :  { %490 = vsyncpa [#allocation3], 1 }
 0x3b3   :  { %491 = vsyncpa [#allocation6], 1 }
 0x3b4   :  { %492 = vsyncpa [#allocation4], 1 }

</bundles_post_ra>
